<compile_context>
chip_gen: v7x
topology: tpu7x:2x2x1
jax: 0.10.0
libtpu: 0.0.40
codegen_flags: <defaults>
</compile_context>

<pallas_src>
from functools import partial

import jax
import jax.numpy as jnp
from jax.experimental import pallas as pl
from jax.experimental.pallas import tpu as pltpu


def _erf(x):
    # Abramowitz & Stegun 7.1.26 rational approximation (|err| < 1.5e-7),
    # built only from ops guaranteed to lower on the Mosaic backend.
    a1, a2, a3, a4, a5 = (0.254829592, -0.284496736, 1.421413741,
                          -1.453152027, 1.061405429)
    p = 0.3275911
    ax = jnp.abs(x)
    t = 1.0 / (1.0 + p * ax)
    poly = ((((a5 * t + a4) * t + a3) * t + a2) * t + a1) * t
    y = 1.0 - poly * jnp.exp(-ax * ax)
    return jnp.where(x < 0.0, -y, y)


def _gelu_exact(x):
    # F.gelu default ("none"): 0.5 * x * (1 + erf(x / sqrt(2)))
    return 0.5 * x * (1.0 + _erf(x * 0.7071067811865476))


def transformer_block_kernel(x_ref, wq_ref, wk_ref, wv_ref, wo_ref, bo_ref,
                             wf_ref, bf_ref, out_ref, *, heads):
    # x_ref block: (1, d, p) -- one batch element, native channels-first.
    x_cf = x_ref[0].astype(jnp.float32)                    # (d, p)
    xt = x_cf.T                                            # (p, d) channels-last

    bo = bo_ref[...].astype(jnp.float32)                   # (1, d)
    bf = bf_ref[...].astype(jnp.float32)                   # (1, d)

    # ---- multi-head attention, heads fused into the to_out accumulation ----
    # Per-head weights are pre-split wrapper-side -> only leading-axis ref
    # indexing here (sublane-aligned); no lane slices, no lane concatenate.
    acc = jnp.zeros(xt.shape, jnp.float32)                 # (p, d)
    for h in range(heads):                                 # static, short unroll
        q = jnp.dot(xt, wq_ref[h].astype(jnp.float32),
                    preferred_element_type=jnp.float32)    # (p, dh), scale folded
        k = jnp.dot(xt, wk_ref[h].astype(jnp.float32),
                    preferred_element_type=jnp.float32)    # (p, dh)
        v = jnp.dot(xt, wv_ref[h].astype(jnp.float32),
                    preferred_element_type=jnp.float32)    # (p, dh)

        dots = jnp.dot(q, k.T, preferred_element_type=jnp.float32)   # (p, p)
        m = jnp.max(dots, axis=-1, keepdims=True)
        e = jnp.exp(dots - m)
        inv = pl.reciprocal(jnp.sum(e, axis=-1, keepdims=True), approx=True)
        attn = e * inv
        o_h = jnp.dot(attn, v, preferred_element_type=jnp.float32)   # (p, dh)

        # to_out (Conv1d 1x1 + folded BN) contribution of this head:
        # replaces the head concatenate with a direct accumulation.
        acc = acc + jnp.dot(o_h, wo_ref[h].astype(jnp.float32),
                            preferred_element_type=jnp.float32)      # (p, d)

    # residual + GELU (exact erf form, f32 epilogue -- v5e-friendly)
    att = _gelu_exact(acc + bo + xt)                       # (p, d)

    # ---- ffn: Conv1d(dim->dim, 1, bias=False) + folded BatchNorm1d ----
    f = jnp.dot(att, wf_ref[...].astype(jnp.float32),
                preferred_element_type=jnp.float32) + bf   # (p, d)
    out = _gelu_exact(att + f)                             # (p, d)

    # back to channels-first for the native [b, d, p] store
    # TODO(synk): with p=16 the store lane-width is < 128 (masked vst); a
    # lane-dense (1, d*p) output would require a minor-dim relayout reshape.
    out_ref[0] = out.T.astype(out_ref.dtype)               # (d, p)


def transformer_block(x, params, *, heads, dim_head):
    """x: [b, d, p] (PyTorch NCW) -> [b, d, p]."""
    b, d, p = x.shape
    inner = heads * dim_head
    scale = dim_head ** (-0.5)
    eps = 1e-5

    # ---- to_qkv: split into per-head, transposed weights (scale folded) ----
    wqkv = params["wqkv"]                                  # (3*inner, d)
    wq = wqkv[0 * inner:1 * inner] * scale                 # (inner, d)
    wk = wqkv[1 * inner:2 * inner]
    wv = wqkv[2 * inner:3 * inner]

    def head_split_t(w):                                   # (inner, d) -> (heads, d, dh)
        return jnp.transpose(w.reshape(heads, dim_head, d), (0, 2, 1))

    wq_h = head_split_t(wq)
    wk_h = head_split_t(wk)
    wv_h = head_split_t(wv)

    # ---- fold eval-mode BatchNorm into the 1x1 convs ----
    s1 = params["bn1_gamma"] / jnp.sqrt(params["bn1_var"] + eps)
    w_out_eff = params["w_out"] * s1[:, None]              # (d, inner)
    b_out_eff = (params["b_out"] * s1 + params["bn1_beta"]
                 - params["bn1_mean"] * s1)                # (d,)
    wo_h = jnp.transpose(w_out_eff, (1, 0)).reshape(heads, dim_head, d)
    bo = b_out_eff[None, :]                                # (1, d)

    s2 = params["bn2_gamma"] / jnp.sqrt(params["bn2_var"] + eps)
    wf = (params["w_ffn"] * s2[:, None]).T                 # (d, d)
    bf = (params["bn2_beta"] - params["bn2_mean"] * s2)[None, :]   # (1, d)

    kernel = partial(transformer_block_kernel, heads=heads)

    out = pl.pallas_call(
        kernel,
        out_shape=jax.ShapeDtypeStruct((b, d, p), x.dtype),
        grid_spec=pltpu.PrefetchScalarGridSpec(
            num_scalar_prefetch=0,
            grid=(b,),
            in_specs=[
                pl.BlockSpec((1, d, p), lambda i: (i, 0, 0)),            # x
                pl.BlockSpec((heads, d, dim_head), lambda i: (0, 0, 0)),  # Wq^T/head
                pl.BlockSpec((heads, d, dim_head), lambda i: (0, 0, 0)),  # Wk^T/head
                pl.BlockSpec((heads, d, dim_head), lambda i: (0, 0, 0)),  # Wv^T/head
                pl.BlockSpec((heads, dim_head, d), lambda i: (0, 0, 0)),  # Wo^T/head
                pl.BlockSpec((1, d), lambda i: (0, 0)),                   # folded b_out
                pl.BlockSpec((d, d), lambda i: (0, 0)),                   # folded W_ffn^T
                pl.BlockSpec((1, d), lambda i: (0, 0)),                   # folded b_ffn
            ],
            out_specs=pl.BlockSpec((1, d, p), lambda i: (i, 0, 0)),
        ),
        compiler_params=pltpu.CompilerParams(
            dimension_semantics=("parallel",)),
    )(x, wq_h, wk_h, wv_h, wo_h, bo, wf, bf)

    return out                                             # (b, d, p)


def init_params(key, dim, heads, dim_head):
    inner = heads * dim_head
    k1, k2, k3, k4 = jax.random.split(key, 4)
    return {
        # to_qkv: nn.Linear(dim, 3*inner, bias=False)  -> weight (3*inner, dim)
        "wqkv": 0.05 * jax.random.normal(k1, (3 * inner, dim), jnp.float32),
        # to_out[0]: nn.Conv1d(inner, dim, 1)          -> weight (dim, inner), bias (dim,)
        "w_out": 0.05 * jax.random.normal(k2, (dim, inner), jnp.float32),
        "b_out": 0.05 * jax.random.normal(k3, (dim,), jnp.float32),
        # ffn[0]: nn.Conv1d(dim, dim, 1, bias=False)   -> weight (dim, dim)
        "w_ffn": 0.05 * jax.random.normal(k4, (dim, dim), jnp.float32),
        # BatchNorm1d defaults (eval mode)
        "bn1_gamma": jnp.ones((dim,), jnp.float32),
        "bn1_beta": jnp.zeros((dim,), jnp.float32),
        "bn1_mean": jnp.zeros((dim,), jnp.float32),
        "bn1_var": jnp.ones((dim,), jnp.float32),
        "bn2_gamma": jnp.ones((dim,), jnp.float32),
        "bn2_beta": jnp.zeros((dim,), jnp.float32),
        "bn2_mean": jnp.zeros((dim,), jnp.float32),
        "bn2_var": jnp.ones((dim,), jnp.float32),
    }


if __name__ == "__main__":
    batch, dim, points = 2, 32, 16
    heads, dim_head = 2, 16

    key = jax.random.PRNGKey(0)
    kx, kp = jax.random.split(key)
    x = jax.random.normal(kx, (batch, dim, points), jnp.float32)   # [b, d, p]
    params = init_params(kp, dim, heads, dim_head)

    out = transformer_block(x, params, heads=heads, dim_head=dim_head)
    jax.block_until_ready(out)
    assert out.shape == (batch, dim, points)
    print("KERNEL_OK")
</pallas_src>

<mosaic_0001>
module attributes {stable_mosaic.version = 11 : i64} {
  func.func @transformer_block_kernel(%arg0: i32, %arg1: memref<1x32x16xf32, #tpu.memory_space<vmem>>, %arg2: memref<2x32x16xf32, #tpu.memory_space<vmem>>, %arg3: memref<2x32x16xf32, #tpu.memory_space<vmem>>, %arg4: memref<2x32x16xf32, #tpu.memory_space<vmem>>, %arg5: memref<2x16x32xf32, #tpu.memory_space<vmem>>, %arg6: memref<1x32xf32, #tpu.memory_space<vmem>>, %arg7: memref<32x32xf32, #tpu.memory_space<vmem>>, %arg8: memref<1x32xf32, #tpu.memory_space<vmem>>, %arg9: memref<1x32x16xf32, #tpu.memory_space<vmem>>) attributes {dimension_semantics = [#tpu.dimension_semantics<parallel>], iteration_bounds = array<i64: 2>, scalar_prefetch = 0 : i64, scratch_operands = 0 : i64, tpu.core_type = #tpu.core_type<tc>, window_params = [{transform_indices = @transform_0, window_bounds = array<i64: 1, 32, 16>}, {pipeline_mode = #tpu.pipeline_mode<synchronous>, transform_indices = @transform_1, window_bounds = array<i64: 2, 32, 16>}, {pipeline_mode = #tpu.pipeline_mode<synchronous>, transform_indices = @transform_2, window_bounds = array<i64: 2, 32, 16>}, {pipeline_mode = #tpu.pipeline_mode<synchronous>, transform_indices = @transform_3, window_bounds = array<i64: 2, 32, 16>}, {pipeline_mode = #tpu.pipeline_mode<synchronous>, transform_indices = @transform_4, window_bounds = array<i64: 2, 16, 32>}, {pipeline_mode = #tpu.pipeline_mode<synchronous>, transform_indices = @transform_5, window_bounds = array<i64: 1, 32>}, {pipeline_mode = #tpu.pipeline_mode<synchronous>, transform_indices = @transform_6, window_bounds = array<i64: 32, 32>}, {pipeline_mode = #tpu.pipeline_mode<synchronous>, transform_indices = @transform_7, window_bounds = array<i64: 1, 32>}, {transform_indices = @transform_8, window_bounds = array<i64: 1, 32, 16>}]} {
    %c0 = arith.constant 0 : index
    %c0_0 = arith.constant 0 : index
    %c0_1 = arith.constant 0 : index
    %0 = vector.load %arg1[%c0, %c0_0, %c0_1] : memref<1x32x16xf32, #tpu.memory_space<vmem>>, vector<1x32x16xf32>
    %1 = vector.shape_cast %0 : vector<1x32x16xf32> to vector<32x16xf32>
    %2 = tpu.transpose %1, [1, 0] : vector<32x16xf32> -> vector<16x32xf32>
    %c0_2 = arith.constant 0 : index
    %c0_3 = arith.constant 0 : index
    %3 = vector.load %arg6[%c0_2, %c0_3] : memref<1x32xf32, #tpu.memory_space<vmem>>, vector<1x32xf32>
    %c0_4 = arith.constant 0 : index
    %c0_5 = arith.constant 0 : index
    %4 = vector.load %arg8[%c0_4, %c0_5] : memref<1x32xf32, #tpu.memory_space<vmem>>, vector<1x32xf32>
    %cst = arith.constant 0.000000e+00 : f32
    %5 = vector.broadcast %cst : f32 to vector<16x32xf32>
    %c0_6 = arith.constant 0 : index
    %c0_7 = arith.constant 0 : index
    %c0_8 = arith.constant 0 : index
    %6 = vector.load %arg2[%c0_6, %c0_7, %c0_8] : memref<2x32x16xf32, #tpu.memory_space<vmem>>, vector<1x32x16xf32>
    %7 = vector.shape_cast %6 : vector<1x32x16xf32> to vector<32x16xf32>
    %cst_9 = arith.constant dense<0.000000e+00> : vector<16x16xf32>
    %8 = tpu.matmul %2, %7, %cst_9 {dimension_numbers = #tpu.dot_dimension_numbers<[1], [0], [0], [1], [0, 0, 1, 1], [], []>} : vector<16x32xf32>, vector<32x16xf32>, vector<16x16xf32> -> vector<16x16xf32>
    %c0_10 = arith.constant 0 : index
    %c0_11 = arith.constant 0 : index
    %c0_12 = arith.constant 0 : index
    %9 = vector.load %arg3[%c0_10, %c0_11, %c0_12] : memref<2x32x16xf32, #tpu.memory_space<vmem>>, vector<1x32x16xf32>
    %10 = vector.shape_cast %9 : vector<1x32x16xf32> to vector<32x16xf32>
    %cst_13 = arith.constant dense<0.000000e+00> : vector<16x16xf32>
    %11 = tpu.matmul %2, %10, %cst_13 {dimension_numbers = #tpu.dot_dimension_numbers<[1], [0], [0], [1], [0, 0, 1, 1], [], []>} : vector<16x32xf32>, vector<32x16xf32>, vector<16x16xf32> -> vector<16x16xf32>
    %c0_14 = arith.constant 0 : index
    %c0_15 = arith.constant 0 : index
    %c0_16 = arith.constant 0 : index
    %12 = vector.load %arg4[%c0_14, %c0_15, %c0_16] : memref<2x32x16xf32, #tpu.memory_space<vmem>>, vector<1x32x16xf32>
    %13 = vector.shape_cast %12 : vector<1x32x16xf32> to vector<32x16xf32>
    %cst_17 = arith.constant dense<0.000000e+00> : vector<16x16xf32>
    %14 = tpu.matmul %2, %13, %cst_17 {dimension_numbers = #tpu.dot_dimension_numbers<[1], [0], [0], [1], [0, 0, 1, 1], [], []>} : vector<16x32xf32>, vector<32x16xf32>, vector<16x16xf32> -> vector<16x16xf32>
    %15 = tpu.transpose %11, [1, 0] : vector<16x16xf32> -> vector<16x16xf32>
    %cst_18 = arith.constant dense<0.000000e+00> : vector<16x16xf32>
    %16 = tpu.matmul %8, %15, %cst_18 {dimension_numbers = #tpu.dot_dimension_numbers<[1], [0], [0], [1], [0, 0, 1, 1], [], []>} : vector<16x16xf32>, vector<16x16xf32>, vector<16x16xf32> -> vector<16x16xf32>
    %cst_19 = arith.constant dense<0xFF800000> : vector<16xf32>
    %17 = vector.multi_reduction <maximumf>, %16, %cst_19 [1] : vector<16x16xf32> to vector<16xf32>
    %18 = vector.shape_cast %17 : vector<16xf32> to vector<16x1xf32>
    %19 = vector.broadcast %18 : vector<16x1xf32> to vector<16x16xf32>
    %20 = arith.subf %16, %19 : vector<16x16xf32>
    %21 = math.exp %20 : vector<16x16xf32>
    %cst_20 = arith.constant dense<0.000000e+00> : vector<16xf32>
    %22 = vector.multi_reduction <add>, %21, %cst_20 [1] : vector<16x16xf32> to vector<16xf32>
    %23 = vector.shape_cast %22 : vector<16xf32> to vector<16x1xf32>
    %24 = tpu.reciprocal %23 {approx = true} : vector<16x1xf32> -> vector<16x1xf32>
    %25 = vector.broadcast %24 : vector<16x1xf32> to vector<16x16xf32>
    %26 = arith.mulf %21, %25 : vector<16x16xf32>
    %cst_21 = arith.constant dense<0.000000e+00> : vector<16x16xf32>
    %27 = tpu.matmul %26, %14, %cst_21 {dimension_numbers = #tpu.dot_dimension_numbers<[1], [0], [0], [1], [0, 0, 1, 1], [], []>} : vector<16x16xf32>, vector<16x16xf32>, vector<16x16xf32> -> vector<16x16xf32>
    %c0_22 = arith.constant 0 : index
    %c0_23 = arith.constant 0 : index
    %c0_24 = arith.constant 0 : index
    %28 = vector.load %arg5[%c0_22, %c0_23, %c0_24] : memref<2x16x32xf32, #tpu.memory_space<vmem>>, vector<1x16x32xf32>
    %29 = vector.shape_cast %28 : vector<1x16x32xf32> to vector<16x32xf32>
    %cst_25 = arith.constant dense<0.000000e+00> : vector<16x32xf32>
    %30 = tpu.matmul %27, %29, %cst_25 {dimension_numbers = #tpu.dot_dimension_numbers<[1], [0], [0], [1], [0, 0, 1, 1], [], []>} : vector<16x16xf32>, vector<16x32xf32>, vector<16x32xf32> -> vector<16x32xf32>
    %31 = arith.addf %5, %30 : vector<16x32xf32>
    %c1 = arith.constant 1 : index
    %c0_26 = arith.constant 0 : index
    %c0_27 = arith.constant 0 : index
    %32 = vector.load %arg2[%c1, %c0_26, %c0_27] : memref<2x32x16xf32, #tpu.memory_space<vmem>>, vector<1x32x16xf32>
    %33 = vector.shape_cast %32 : vector<1x32x16xf32> to vector<32x16xf32>
    %cst_28 = arith.constant dense<0.000000e+00> : vector<16x16xf32>
    %34 = tpu.matmul %2, %33, %cst_28 {dimension_numbers = #tpu.dot_dimension_numbers<[1], [0], [0], [1], [0, 0, 1, 1], [], []>} : vector<16x32xf32>, vector<32x16xf32>, vector<16x16xf32> -> vector<16x16xf32>
    %c1_29 = arith.constant 1 : index
    %c0_30 = arith.constant 0 : index
    %c0_31 = arith.constant 0 : index
    %35 = vector.load %arg3[%c1_29, %c0_30, %c0_31] : memref<2x32x16xf32, #tpu.memory_space<vmem>>, vector<1x32x16xf32>
    %36 = vector.shape_cast %35 : vector<1x32x16xf32> to vector<32x16xf32>
    %cst_32 = arith.constant dense<0.000000e+00> : vector<16x16xf32>
    %37 = tpu.matmul %2, %36, %cst_32 {dimension_numbers = #tpu.dot_dimension_numbers<[1], [0], [0], [1], [0, 0, 1, 1], [], []>} : vector<16x32xf32>, vector<32x16xf32>, vector<16x16xf32> -> vector<16x16xf32>
    %c1_33 = arith.constant 1 : index
    %c0_34 = arith.constant 0 : index
    %c0_35 = arith.constant 0 : index
    %38 = vector.load %arg4[%c1_33, %c0_34, %c0_35] : memref<2x32x16xf32, #tpu.memory_space<vmem>>, vector<1x32x16xf32>
    %39 = vector.shape_cast %38 : vector<1x32x16xf32> to vector<32x16xf32>
    %cst_36 = arith.constant dense<0.000000e+00> : vector<16x16xf32>
    %40 = tpu.matmul %2, %39, %cst_36 {dimension_numbers = #tpu.dot_dimension_numbers<[1], [0], [0], [1], [0, 0, 1, 1], [], []>} : vector<16x32xf32>, vector<32x16xf32>, vector<16x16xf32> -> vector<16x16xf32>
    %41 = tpu.transpose %37, [1, 0] : vector<16x16xf32> -> vector<16x16xf32>
    %cst_37 = arith.constant dense<0.000000e+00> : vector<16x16xf32>
    %42 = tpu.matmul %34, %41, %cst_37 {dimension_numbers = #tpu.dot_dimension_numbers<[1], [0], [0], [1], [0, 0, 1, 1], [], []>} : vector<16x16xf32>, vector<16x16xf32>, vector<16x16xf32> -> vector<16x16xf32>
    %cst_38 = arith.constant dense<0xFF800000> : vector<16xf32>
    %43 = vector.multi_reduction <maximumf>, %42, %cst_38 [1] : vector<16x16xf32> to vector<16xf32>
    %44 = vector.shape_cast %43 : vector<16xf32> to vector<16x1xf32>
    %45 = vector.broadcast %44 : vector<16x1xf32> to vector<16x16xf32>
    %46 = arith.subf %42, %45 : vector<16x16xf32>
    %47 = math.exp %46 : vector<16x16xf32>
    %cst_39 = arith.constant dense<0.000000e+00> : vector<16xf32>
    %48 = vector.multi_reduction <add>, %47, %cst_39 [1] : vector<16x16xf32> to vector<16xf32>
    %49 = vector.shape_cast %48 : vector<16xf32> to vector<16x1xf32>
    %50 = tpu.reciprocal %49 {approx = true} : vector<16x1xf32> -> vector<16x1xf32>
    %51 = vector.broadcast %50 : vector<16x1xf32> to vector<16x16xf32>
    %52 = arith.mulf %47, %51 : vector<16x16xf32>
    %cst_40 = arith.constant dense<0.000000e+00> : vector<16x16xf32>
    %53 = tpu.matmul %52, %40, %cst_40 {dimension_numbers = #tpu.dot_dimension_numbers<[1], [0], [0], [1], [0, 0, 1, 1], [], []>} : vector<16x16xf32>, vector<16x16xf32>, vector<16x16xf32> -> vector<16x16xf32>
    %c1_41 = arith.constant 1 : index
    %c0_42 = arith.constant 0 : index
    %c0_43 = arith.constant 0 : index
    %54 = vector.load %arg5[%c1_41, %c0_42, %c0_43] : memref<2x16x32xf32, #tpu.memory_space<vmem>>, vector<1x16x32xf32>
    %55 = vector.shape_cast %54 : vector<1x16x32xf32> to vector<16x32xf32>
    %cst_44 = arith.constant dense<0.000000e+00> : vector<16x32xf32>
    %56 = tpu.matmul %53, %55, %cst_44 {dimension_numbers = #tpu.dot_dimension_numbers<[1], [0], [0], [1], [0, 0, 1, 1], [], []>} : vector<16x16xf32>, vector<16x32xf32>, vector<16x32xf32> -> vector<16x32xf32>
    %57 = arith.addf %31, %56 : vector<16x32xf32>
    %58 = vector.broadcast %3 : vector<1x32xf32> to vector<16x32xf32>
    %59 = arith.addf %57, %58 : vector<16x32xf32>
    %60 = arith.addf %59, %2 : vector<16x32xf32>
    %cst_45 = arith.constant 5.000000e-01 : f32
    %61 = vector.broadcast %cst_45 : f32 to vector<16x32xf32>
    %62 = arith.mulf %61, %60 : vector<16x32xf32>
    %cst_46 = arith.constant 0.707106769 : f32
    %63 = vector.broadcast %cst_46 : f32 to vector<16x32xf32>
    %64 = arith.mulf %60, %63 : vector<16x32xf32>
    %65 = math.absf %64 : vector<16x32xf32>
    %cst_47 = arith.constant 0.327591091 : f32
    %66 = vector.broadcast %cst_47 : f32 to vector<16x32xf32>
    %67 = arith.mulf %66, %65 : vector<16x32xf32>
    %cst_48 = arith.constant 1.000000e+00 : f32
    %68 = vector.broadcast %cst_48 : f32 to vector<16x32xf32>
    %69 = arith.addf %68, %67 : vector<16x32xf32>
    %cst_49 = arith.constant 1.000000e+00 : f32
    %70 = vector.broadcast %cst_49 : f32 to vector<16x32xf32>
    %71 = arith.divf %70, %69 : vector<16x32xf32>
    %cst_50 = arith.constant 1.06140542 : f32
    %72 = vector.broadcast %cst_50 : f32 to vector<16x32xf32>
    %73 = arith.mulf %72, %71 : vector<16x32xf32>
    %cst_51 = arith.constant -1.45315206 : f32
    %74 = vector.broadcast %cst_51 : f32 to vector<16x32xf32>
    %75 = arith.addf %73, %74 : vector<16x32xf32>
    %76 = arith.mulf %75, %71 : vector<16x32xf32>
    %cst_52 = arith.constant 1.42141378 : f32
    %77 = vector.broadcast %cst_52 : f32 to vector<16x32xf32>
    %78 = arith.addf %76, %77 : vector<16x32xf32>
    %79 = arith.mulf %78, %71 : vector<16x32xf32>
    %cst_53 = arith.constant -0.284496725 : f32
    %80 = vector.broadcast %cst_53 : f32 to vector<16x32xf32>
    %81 = arith.addf %79, %80 : vector<16x32xf32>
    %82 = arith.mulf %81, %71 : vector<16x32xf32>
    %cst_54 = arith.constant 0.254829586 : f32
    %83 = vector.broadcast %cst_54 : f32 to vector<16x32xf32>
    %84 = arith.addf %82, %83 : vector<16x32xf32>
    %85 = arith.mulf %84, %71 : vector<16x32xf32>
    %cst_55 = arith.constant 0.000000e+00 : f32
    %86 = vector.broadcast %cst_55 : f32 to vector<16x32xf32>
    %87 = arith.subf %86, %65 : vector<16x32xf32>
    %88 = arith.mulf %87, %65 : vector<16x32xf32>
    %89 = math.exp %88 : vector<16x32xf32>
    %90 = arith.mulf %85, %89 : vector<16x32xf32>
    %cst_56 = arith.constant 1.000000e+00 : f32
    %91 = vector.broadcast %cst_56 : f32 to vector<16x32xf32>
    %92 = arith.subf %91, %90 : vector<16x32xf32>
    %cst_57 = arith.constant 0.000000e+00 : f32
    %93 = vector.broadcast %cst_57 : f32 to vector<16x32xf32>
    %94 = arith.cmpf olt, %64, %93 : vector<16x32xf32>
    %cst_58 = arith.constant 0.000000e+00 : f32
    %95 = vector.broadcast %cst_58 : f32 to vector<16x32xf32>
    %96 = arith.subf %95, %92 : vector<16x32xf32>
    %97 = arith.select %94, %96, %92 : vector<16x32xi1>, vector<16x32xf32>
    %cst_59 = arith.constant 1.000000e+00 : f32
    %98 = vector.broadcast %cst_59 : f32 to vector<16x32xf32>
    %99 = arith.addf %98, %97 : vector<16x32xf32>
    %100 = arith.mulf %62, %99 : vector<16x32xf32>
    %c0_60 = arith.constant 0 : index
    %c0_61 = arith.constant 0 : index
    %101 = vector.load %arg7[%c0_60, %c0_61] : memref<32x32xf32, #tpu.memory_space<vmem>>, vector<32x32xf32>
    %cst_62 = arith.constant dense<0.000000e+00> : vector<16x32xf32>
    %102 = tpu.matmul %100, %101, %cst_62 {dimension_numbers = #tpu.dot_dimension_numbers<[1], [0], [0], [1], [0, 0, 1, 1], [], []>} : vector<16x32xf32>, vector<32x32xf32>, vector<16x32xf32> -> vector<16x32xf32>
    %103 = vector.broadcast %4 : vector<1x32xf32> to vector<16x32xf32>
    %104 = arith.addf %102, %103 : vector<16x32xf32>
    %105 = arith.addf %100, %104 : vector<16x32xf32>
    %cst_63 = arith.constant 5.000000e-01 : f32
    %106 = vector.broadcast %cst_63 : f32 to vector<16x32xf32>
    %107 = arith.mulf %106, %105 : vector<16x32xf32>
    %cst_64 = arith.constant 0.707106769 : f32
    %108 = vector.broadcast %cst_64 : f32 to vector<16x32xf32>
    %109 = arith.mulf %105, %108 : vector<16x32xf32>
    %110 = math.absf %109 : vector<16x32xf32>
    %cst_65 = arith.constant 0.327591091 : f32
    %111 = vector.broadcast %cst_65 : f32 to vector<16x32xf32>
    %112 = arith.mulf %111, %110 : vector<16x32xf32>
    %cst_66 = arith.constant 1.000000e+00 : f32
    %113 = vector.broadcast %cst_66 : f32 to vector<16x32xf32>
    %114 = arith.addf %113, %112 : vector<16x32xf32>
    %cst_67 = arith.constant 1.000000e+00 : f32
    %115 = vector.broadcast %cst_67 : f32 to vector<16x32xf32>
    %116 = arith.divf %115, %114 : vector<16x32xf32>
    %cst_68 = arith.constant 1.06140542 : f32
    %117 = vector.broadcast %cst_68 : f32 to vector<16x32xf32>
    %118 = arith.mulf %117, %116 : vector<16x32xf32>
    %cst_69 = arith.constant -1.45315206 : f32
    %119 = vector.broadcast %cst_69 : f32 to vector<16x32xf32>
    %120 = arith.addf %118, %119 : vector<16x32xf32>
    %121 = arith.mulf %120, %116 : vector<16x32xf32>
    %cst_70 = arith.constant 1.42141378 : f32
    %122 = vector.broadcast %cst_70 : f32 to vector<16x32xf32>
    %123 = arith.addf %121, %122 : vector<16x32xf32>
    %124 = arith.mulf %123, %116 : vector<16x32xf32>
    %cst_71 = arith.constant -0.284496725 : f32
    %125 = vector.broadcast %cst_71 : f32 to vector<16x32xf32>
    %126 = arith.addf %124, %125 : vector<16x32xf32>
    %127 = arith.mulf %126, %116 : vector<16x32xf32>
    %cst_72 = arith.constant 0.254829586 : f32
    %128 = vector.broadcast %cst_72 : f32 to vector<16x32xf32>
    %129 = arith.addf %127, %128 : vector<16x32xf32>
    %130 = arith.mulf %129, %116 : vector<16x32xf32>
    %cst_73 = arith.constant 0.000000e+00 : f32
    %131 = vector.broadcast %cst_73 : f32 to vector<16x32xf32>
    %132 = arith.subf %131, %110 : vector<16x32xf32>
    %133 = arith.mulf %132, %110 : vector<16x32xf32>
    %134 = math.exp %133 : vector<16x32xf32>
    %135 = arith.mulf %130, %134 : vector<16x32xf32>
    %cst_74 = arith.constant 1.000000e+00 : f32
    %136 = vector.broadcast %cst_74 : f32 to vector<16x32xf32>
    %137 = arith.subf %136, %135 : vector<16x32xf32>
    %cst_75 = arith.constant 0.000000e+00 : f32
    %138 = vector.broadcast %cst_75 : f32 to vector<16x32xf32>
    %139 = arith.cmpf olt, %109, %138 : vector<16x32xf32>
    %cst_76 = arith.constant 0.000000e+00 : f32
    %140 = vector.broadcast %cst_76 : f32 to vector<16x32xf32>
    %141 = arith.subf %140, %137 : vector<16x32xf32>
    %142 = arith.select %139, %141, %137 : vector<16x32xi1>, vector<16x32xf32>
    %cst_77 = arith.constant 1.000000e+00 : f32
    %143 = vector.broadcast %cst_77 : f32 to vector<16x32xf32>
    %144 = arith.addf %143, %142 : vector<16x32xf32>
    %145 = arith.mulf %107, %144 : vector<16x32xf32>
    %146 = tpu.transpose %145, [1, 0] : vector<16x32xf32> -> vector<32x16xf32>
    %c0_78 = arith.constant 0 : index
    %c0_79 = arith.constant 0 : index
    %c0_80 = arith.constant 0 : index
    %147 = vector.load %arg9[%c0_78, %c0_79, %c0_80] : memref<1x32x16xf32, #tpu.memory_space<vmem>>, vector<1x32x16xf32>
    %148 = vector.shape_cast %147 : vector<1x32x16xf32> to vector<32x16xf32>
    %149 = vector.shape_cast %146 : vector<32x16xf32> to vector<1x32x16xf32>
    tpu.vector_store %arg9[%c0_78, %c0_79, %c0_80], %149 {strides = array<i32>} : memref<1x32x16xf32, #tpu.memory_space<vmem>>, vector<1x32x16xf32>,
    return
  }
  func.func @transform_0(%arg0: i32) -> (i32, i32, i32) {
    %c0_i32 = arith.constant 0 : i32
    %c0_i32_0 = arith.constant 0 : i32
    %c0_i32_1 = arith.constant 0 : i32
    return %arg0, %c0_i32, %c0_i32_0 : i32, i32, i32
  }
  func.func @transform_1(%arg0: i32) -> (i32, i32, i32) {
    %c0_i32 = arith.constant 0 : i32
    %c0_i32_0 = arith.constant 0 : i32
    %c0_i32_1 = arith.constant 0 : i32
    %c0_i32_2 = arith.constant 0 : i32
    return %c0_i32, %c0_i32_0, %c0_i32_1 : i32, i32, i32
  }
  func.func @transform_2(%arg0: i32) -> (i32, i32, i32) {
    %c0_i32 = arith.constant 0 : i32
    %c0_i32_0 = arith.constant 0 : i32
    %c0_i32_1 = arith.constant 0 : i32
    %c0_i32_2 = arith.constant 0 : i32
    return %c0_i32, %c0_i32_0, %c0_i32_1 : i32, i32, i32
  }
  func.func @transform_3(%arg0: i32) -> (i32, i32, i32) {
    %c0_i32 = arith.constant 0 : i32
    %c0_i32_0 = arith.constant 0 : i32
    %c0_i32_1 = arith.constant 0 : i32
    %c0_i32_2 = arith.constant 0 : i32
    return %c0_i32, %c0_i32_0, %c0_i32_1 : i32, i32, i32
  }
  func.func @transform_4(%arg0: i32) -> (i32, i32, i32) {
    %c0_i32 = arith.constant 0 : i32
    %c0_i32_0 = arith.constant 0 : i32
    %c0_i32_1 = arith.constant 0 : i32
    %c0_i32_2 = arith.constant 0 : i32
    return %c0_i32, %c0_i32_0, %c0_i32_1 : i32, i32, i32
  }
  func.func @transform_5(%arg0: i32) -> (i32, i32) {
    %c0_i32 = arith.constant 0 : i32
    %c0_i32_0 = arith.constant 0 : i32
    %c0_i32_1 = arith.constant 0 : i32
    return %c0_i32, %c0_i32_0 : i32, i32
  }
  func.func @transform_6(%arg0: i32) -> (i32, i32) {
    %c0_i32 = arith.constant 0 : i32
    %c0_i32_0 = arith.constant 0 : i32
    %c0_i32_1 = arith.constant 0 : i32
    return %c0_i32, %c0_i32_0 : i32, i32
  }
  func.func @transform_7(%arg0: i32) -> (i32, i32) {
    %c0_i32 = arith.constant 0 : i32
    %c0_i32_0 = arith.constant 0 : i32
    %c0_i32_1 = arith.constant 0 : i32
    return %c0_i32, %c0_i32_0 : i32, i32
  }
  func.func @transform_8(%arg0: i32) -> (i32, i32, i32) {
    %c0_i32 = arith.constant 0 : i32
    %c0_i32_0 = arith.constant 0 : i32
    %c0_i32_1 = arith.constant 0 : i32
    return %arg0, %c0_i32, %c0_i32_0 : i32, i32, i32
  }
}

</mosaic_0001>

<bundles_post_ra>
// kernel: tpu_custom_call.1
= control target key start
LH: loop header
LB: loop body
LE: loop exit
PB: predicated region body
PF: predicated region fallthrough
CT: control target
= control target key end

     0   :  { %s2102_s27 = smov 0   ;;  %s2298_s0 = inlined_call_operand.vmem [shape: f32[2,32,16], index: 0, kind: input, shape index: {}]   ;;  %s2299_s1 = inlined_call_operand.vmem [shape: f32[2,32,16], index: 1, kind: input, shape index: {}]   ;;  %s2300_s2 = inlined_call_operand.vmem [shape: f32[2,32,16], index: 2, kind: input, shape index: {}]   ;;  %s2301_s3 = inlined_call_operand.vmem [shape: f32[2,32,16], index: 3, kind: input, shape index: {}]   ;;  %s2302_s4 = inlined_call_operand.vmem [shape: f32[2,16,32], index: 4, kind: input, shape index: {}]   ;;  %s2303_s5 = inlined_call_operand.vmem [shape: f32[1,32], index: 5, kind: input, shape index: {}]   ;;  %s2304_s6 = inlined_call_operand.vmem [shape: f32[32,32], index: 6, kind: input, shape index: {}]   ;;  %s2305_s7 = inlined_call_operand.vmem [shape: f32[1,32], index: 7, kind: input, shape index: {}]   ;;  %s2306_s8 = inlined_call_operand.vmem [shape: f32[2,32,16], index: 8, kind: output, shape index: {}]  }
   0x1 LB: > { %s1678_s28 = sadd.s32 4294967295, %s2055_s27   ;;  %p1682_p0 = scmp.ge.s32.totalorder %s2055_s27, 1  ;;  %s2055_s27 = sphi %s2102_s27, %s18_s27  }
   0x2   : > { %p262_p1 = scmp.lt.s32.totalorder %s2055_s27, 3 }
   0x4   : > { %p263_p2 = pnand %p1682_p0, %p262_p1 }
   0x5   : > { %p296_p3 = scmp.lt.s32.totalorder (!%p263_p2), %s1678_s28, 1  ;;  %v344_v0 = vld [vmem:[%s2299_s1] sm:$0xff] (!%p263_p2)  ;;  %v345_v1 = vld [vmem:[%s2299_s1 + $0x8] sm:$0xff] (!%p263_p2)  ;;  %v346_v5 = vld [vmem:[%s2299_s1 + $0x10] sm:$0xff] (!%p263_p2)  ;;  %vm348_vm0 = vcmask (!%p263_p2), 261120   ;;  %vm588_vm1 = vcmask (!%p263_p2), 130048  }
   0x6   : > { %266 = sbr.rel (%p263_p2) target bundleno = 2561 (0xa01), region = 52  ;;  %v430_v2 = vld [vmem:[%s2300_s2] sm:$0xff] (!%p263_p2)  ;;  %v1922_v3 = vpack.c.bf16 (!%p263_p2), %v345_v1, %v344_v0  ;;  %v431_v4 = vld [vmem:[%s2300_s2 + $0x8] sm:$0xff] (!%p263_p2)  ;;  %v347_v6 = vld [vmem:[%s2299_s1 + $0x18] sm:$0xff] (!%p263_p2) }
   0x7   : > { %v1930_v7 = vpack.c.bf16 (!%p263_p2), %v431_v4, %v430_v2  ;;  %v1926_v8 = vpack.c.bf16 (!%p263_p2), %v347_v6, %v346_v5  ;;  %v432_v9 = vld [vmem:[%s2300_s2 + $0x10] sm:$0xff] (!%p263_p2)  ;;  %v433_v10 = vld [vmem:[%s2300_s2 + $0x18] sm:$0xff] (!%p263_p2)  ;;  %v509_v14 = vld [vmem:[%s2301_s3] sm:$0xff] (!%p263_p2) }
   0x8   : > { %1923 = vmatprep.subr.bf16.mxu0 (!%p263_p2), %v1922_v3  ;;  %v1934_v12 = vpack.c.bf16 (!%p263_p2), %v433_v10, %v432_v9  ;;  %v510_v15 = vld [vmem:[%s2301_s3 + $0x8] sm:$0xff] (!%p263_p2)  ;;  %v511_v20 = vld [vmem:[%s2301_s3 + $0x10] sm:$0xff] (!%p263_p2)  ;;  %v512_v21 = vld [vmem:[%s2301_s3 + $0x18] sm:$0xff] (!%p263_p2) }
   0x9   : > { %1925 = vmatpush3.bf16.msra.mxu0 (!%p263_p2), %v1922_v3  ;;  %1931 = vmatprep.subr.bf16.mxu1 (!%p263_p2), %v1930_v7  ;;  %v1938_v16 = vpack.c.bf16 (!%p263_p2), %v510_v15, %v509_v14  ;;  %v1942_v22 = vpack.c.bf16 (!%p263_p2), %v512_v21, %v511_v20  ;;  %v1699_v24 = vld [vmem:[%s2299_s1 + $0x20] sm:$0xff] (!%p263_p2)  ;;  %v1700_v25 = vld [vmem:[%s2299_s1 + $0x28] sm:$0xff] (!%p263_p2)  ;;  %vm2178_vm2 = vmpackc.low (!%p263_p2), %vm588_vm1, %vm588_vm1 }
   0xa   : > { %1933 = vmatpush3.bf16.msra.mxu1 (!%p263_p2), %v1930_v7  ;;  %1927 = vmatprep.subr.bf16.mxu0 (!%p263_p2), %v1926_v8  ;;  %v1956_v32 = vpack.c.bf16 (!%p263_p2), %v1700_v25, %v1699_v24  ;;  %v1701_v33 = vld [vmem:[%s2299_s1 + $0x30] sm:$0xff] (!%p263_p2)  ;;  %v1702_v34 = vld [vmem:[%s2299_s1 + $0x38] sm:$0xff] (!%p263_p2)  ;;  %v1711_v39 = vld [vmem:[%s2301_s3 + $0x20] sm:$0xff] (!%p263_p2) }
   0xb   : > { %1935 = vmatprep.subr.bf16.mxu1 (!%p263_p2), %v1934_v12  ;;  %v1960_v38 = vpack.c.bf16 (!%p263_p2), %v1702_v34, %v1701_v33  ;;  %v1712_v40 = vld [vmem:[%s2301_s3 + $0x28] sm:$0xff] (!%p263_p2)  ;;  %v1713_v42 = vld [vmem:[%s2301_s3 + $0x30] sm:$0xff] (!%p263_p2)  ;;  %v1714_v43 = vld [vmem:[%s2301_s3 + $0x38] sm:$0xff] (!%p263_p2) }
   0xc   : > { %v1972_v41 = vpack.c.bf16 (!%p263_p2), %v1712_v40, %v1711_v39  ;;  %v1976_v44 = vpack.c.bf16 (!%p263_p2), %v1714_v43, %v1713_v42  ;;  %v1705_v0 = vld [vmem:[%s2300_s2 + $0x20] sm:$0xff] (!%p263_p2)  ;;  %v1706_v1 = vld [vmem:[%s2300_s2 + $0x28] sm:$0xff] (!%p263_p2)  ;;  %v1707_v7 = vld [vmem:[%s2300_s2 + $0x30] sm:$0xff] (!%p263_p2) }
   0xd   : > { %s2310_s28 = smov (!%p296_p3, %s1678_s28), 1  ;;  %1929 = vmatpush3.bf16.msra.mxu0 %v1926_v8  ;;  %v1964_v2 = vpack.c.bf16 %v1706_v1, %v1705_v0  ;;  %v1708_v8 = vld [vmem:[%s2300_s2 + $0x38] sm:$0xff]  ;;  %v1723_v33 = vld [vmem:[%s2302_s4 + $0x10] sm:$0xff]  ;;  %v779_v42 = vld [vmem:[%s2302_s4] sm:$0xff] }
   0xe   : > { %s1735_s19 = sshll.u32 %s2310_s28, 5  ;;  %1937 = vmatpush3.bf16.msra.mxu1 %v1934_v12  ;;  %1939 = vmatprep.subr.bf16.mxu0 %v1938_v16  ;;  %v1724_v34 = vld [vmem:[%s2302_s4 + $0x18] sm:$0xff]  ;;  %v780_v43 = vld [vmem:[%s2302_s4 + $0x8] sm:$0xff] }
   0xf   : > { %s300_s22 = scalar_lea.vmem %s2298_s0, %s1735_s19  ;;  %s305_s24 = scalar_lea.vmem %s2306_s8, %s1735_s19 }
  0x10   : > { %v306_v11 = vld [vmem:[%s300_s22] sm:$0xff]  ;;  %v307_v13 = vld [vmem:[%s300_s22 + $0x8] sm:$0xff]  ;;  %v308_v17 = vld [vmem:[%s300_s22 + $0x10] sm:$0xff] }
  0x11   : > { %310 = vxpose.xlu0.b32.start [1/4] (short) (narrow) %v306_v11, 16  ;;  %v309_v18 = vld [vmem:[%s300_s22 + $0x18] sm:$0xff]  ;;  %v1968_v11 = vpack.c.bf16 %v1708_v8, %v1707_v7 }
  0x15   : > { %311 = vxpose.xlu0.b32.cont [2/4] (short) (narrow) %v307_v13, 16 }
  0x19   : > { %312 = vxpose.xlu0.b32.cont [3/4] (short) (narrow) %v308_v17, 16 }
  0x1d   : > { %313 = vxpose.xlu0.b32.end [4/4] (short) (narrow) %v309_v18, 16 }
  0x91   : > { %v2148_v19 = vpop.trf.xlu0 }
  0x92   : > { %1811 = vmatprep.mubr.msk.f32.mxu0 %vm348_vm0, %v2148_v19  ;;  %1822 = vmatprep.mubr.msk.f32.mxu1 %vm348_vm0, %v2148_v19 }
  0x95   : > { %v2160_v23 = vpop.trf.xlu0 }
  0x96   : > { %1812 = vmatmul.mubr.msk.f32.vlgmr.msra.gmra.mrb[0].mxu0 %vm348_vm0, %v2160_v23  ;;  %1823 = vmatmul.mubr.msk.f32.vlgmr.msra.gmra.mrb[0].mxu1 %vm348_vm0, %v2160_v23 }
  0x97   : > { %1941 = vmatpush3.bf16.msra.mxu0 %v1938_v16  ;;  %1833 = vmatprep.mubr.msk.f32.mxu0 %vm348_vm0, %v2148_v19 }
  0x98   : > { %1943 = vmatprep.subr.bf16.mxu0 %v1942_v22 }
  0x9b   : > { %1945 = vmatpush3.bf16.msra.mxu0 %v1942_v22 }
  0x9e   : > { %1834 = vmatmul.mubr.msk.f32.vlgmr.msra.gmra.mrb[2].mxu0 %vm348_vm0, %v2160_v23 }
 0x169   : > { %v1813_v26 = vpop.f32.mrb[0].mxu0  ;;  %v1824_v27 = vpop.f32.mrb[0].mxu1 }
 0x16a   : > { %v421_v28 = vpop.f32.mrb[1].mxu0  ;;  %v500_v29 = vpop.f32.mrb[1].mxu1 }
 0x16b   : > { %v1946_v31 = vpack.c.bf16 %v1824_v27, %v500_v29  ;;  %1840 = vmatprep.mubr.msk.f32.mxu1 %vm588_vm1, %v421_v28 }
 0x16d   : > { %1948 = vmatprep.subr.msk.bf16.mxu1 %vm2178_vm2, %v1946_v31 }
 0x16e   : > { %1951 = vmatpush3.bf16.xpose.msk.msra.mxu1 %vm2178_vm2, %v1946_v31 }
 0x16f   : > { %1957 = vmatprep.subr.bf16.mxu1 %v1956_v32 }
 0x171   : > { %v1835_v35 = vpop.f32.mrb[2].mxu0 }
 0x172   : > { %v579_v36 = vpop.f32.mrb[3].mxu0 }
 0x173   : > { %v1952_v37 = vpack.c.bf16 %v1835_v35, %v579_v36  ;;  %v1990_v35 = vpack.c.bf16 %v1724_v34, %v1723_v33 }
 0x175   : > { %1953 = vmatprep.subr.bf16.mxu0 %v1952_v37  ;;  %1841 = vmatmul.mubr.msk.f32.vlgmr.msra.gmra.mrb[2].mxu1 %vm588_vm1, %v1813_v26 }
 0x176   : > { %1955 = vmatpush3.bf16.msra.mxu0 %v1952_v37  ;;  %1959 = vmatpush3.bf16.msra.mxu1 %v1956_v32 }
 0x177   : > { %1858 = vmatprep.mubr.msk.f32.mxu1 %vm348_vm0, %v2148_v19  ;;  %1961 = vmatprep.subr.bf16.mxu1 %v1960_v38 }
 0x178   : > { %1965 = vmatprep.subr.bf16.mxu0 %v1964_v2 }
 0x17a   : > { %1963 = vmatpush3.bf16.msra.mxu1 %v1960_v38 }
 0x17b   : > { %1973 = vmatprep.subr.bf16.mxu1 %v1972_v41 }
 0x17d   : > { %1859 = vmatmul.mubr.msk.f32.vlgmr.msra.gmra.mrb[4].mxu1 %vm348_vm0, %v2160_v23 }
 0x17e   : > { %1975 = vmatpush3.bf16.msra.mxu1 %v1972_v41  ;;  %1880 = vmatprep.mubr.msk.f32.mxu1 %vm348_vm0, %v2148_v19 }
 0x17f   : > { %1977 = vmatprep.subr.bf16.mxu1 %v1976_v44 }
 0x182   : > { %1979 = vmatpush3.bf16.msra.mxu1 %v1976_v44  ;;  %v1994_v44 = vpack.c.bf16 %v780_v43, %v779_v42 }
 0x185   : > { %1881 = vmatmul.mubr.msk.f32.vlgmr.msra.gmra.mrb[6].mxu1 %vm348_vm0, %v2160_v23 }
 0x248   : > { %v1842_v45 = vpop.f32.mrb[2].mxu1 }
 0x249   : > { %v667_v46 = vpop.f32.mrb[3].mxu1  ;;  %v679_v48 = vsel %vm588_vm1, %v1842_v45, -inf }
 0x24a   : > { %v676_v47 = vsel %vm588_vm1, %v667_v46, -inf }
 0x24b   : > { %677 = vmax.xlane.f32.xlu1 %v676_v47  ;;  %v1440_v47 = vld [vmem:[%s2304_s6] sm:$0xff] }
 0x24f   : > { %680 = vmax.xlane.f32.xlu1 %v679_v48  ;;  %v1441_v48 = vld [vmem:[%s2304_s6 + $0x8] sm:$0xff] }
 0x250   : > { %v1860_v49 = vpop.f32.mrb[4].mxu1 }
 0x251   : > { %v852_v50 = vpop.f32.mrb[5].mxu1 }
 0x258   : > { %v1882_v51 = vpop.f32.mrb[6].mxu1 }
 0x259   : > { %v1012_v52 = vpop.f32.mrb[7].mxu1 }
 0x25a   : > { %v1986_v53 = vpack.c.bf16 %v1882_v51, %v1012_v52  ;;  %v1443_v51 = vld [vmem:[%s2304_s6 + $0x18] sm:$0xff] }
 0x25c   : > { %1987 = vmatprep.subr.bf16.mxu1 %v1986_v53 }
 0x25d   : > { %1989 = vmatpush3.bf16.msra.mxu1 %v1986_v53  ;;  %v1729_v53 = vld [vmem:[%s2303_s5] ss:$0 sm:$0xff] }
 0x2d8   : > { %v678_v54 = vpop.xlane.xlu1 %677 }
 0x2d9   : > { %v682_v55 = vsub.f32 %v667_v46, %v678_v54 }
 0x2db   : > { %v684_v56 = vmul.f32 1.442695, %v682_v55 }
 0x2dc   : > { %v681_v57 = vpop.xlane.xlu1 %680 }
 0x2dd   : > { %2017 = vpow2.f32 %v684_v56  ;;  %v683_v58 = vsub.f32 %v1842_v45, %v681_v57 }
 0x2df   : > { %v686_v59 = vmul.f32 1.442695, %v683_v58 }
 0x2e1   : > { %2019 = vpow2.f32 %v686_v59 }
 0x2e7   : > { %v2018_v60 = vpop.eup %2017 }
 0x2e8   : > { %v688_v61 = vsel %vm588_vm1, %v2018_v60, 0.0 }
 0x2e9   : > { %689 = vadd.xlane.f32.xlu1 %v688_v61 }
 0x2eb   : > { %v2020_v62 = vpop.eup %2019 }
 0x2ec   : > { %v691_v63 = vsel %vm588_vm1, %v2020_v62, 0.0 }
 0x2ed   : > { %692 = vadd.xlane.f32.xlu1 %v691_v63 }
 0x376   : > { %v690_v3 = vpop.xlane.xlu1 %689 }
 0x377   : > { %2021 = vrcp.f32 %v690_v3 }
 0x37a   : > { %v693_v4 = vpop.xlane.xlu1 %692 }
 0x37b   : > { %2023 = vrcp.f32 %v693_v4 }
 0x381   : > { %v2022_v5 = vpop.eup %2021 }
 0x382   : > { %v696_v6 = vmul.f32 %v2022_v5, %v2018_v60 }
 0x384   : > { %1847 = vmatprep.mubr.msk.f32.mxu0 %vm588_vm1, %v696_v6 }
 0x385   : > { %v2024_v9 = vpop.eup %2023 }
 0x386   : > { %v697_v10 = vmul.f32 %v2024_v9, %v2020_v62 }
 0x388   : > { %1848 = vmatmul.mubr.msk.f32.vlgmr.msra.gmra.mrb[4].mxu0 %vm588_vm1, %v697_v10 }
 0x389   : > { %1967 = vmatpush3.bf16.msra.mxu0 %v1964_v2  ;;  %1869 = vmatprep.mubr.msk.f32.mxu0 %vm348_vm0, %v2148_v19 }
 0x38a   : > { %1969 = vmatprep.subr.bf16.mxu0 %v1968_v11 }
 0x38d   : > { %1971 = vmatpush3.bf16.msra.mxu0 %v1968_v11 }
 0x390   : > { %1870 = vmatmul.mubr.msk.f32.vlgmr.msra.gmra.mrb[6].mxu0 %vm348_vm0, %v2160_v23 }
 0x391   : > { %1887 = vmatprep.mubr.msk.f32.mxu0 %vm588_vm1, %v852_v50  ;;  %v1442_v50 = vld [vmem:[%s2304_s6 + $0x10] sm:$0xff] }
 0x392   : > { %v2002_v52 = vpack.c.bf16 %v1443_v51, %v1442_v50 }
 0x45b   : > { %v1849_v12 = vpop.f32.mrb[4].mxu0 }
 0x45c   : > { %v770_v13 = vpop.f32.mrb[5].mxu0 }
 0x463   : > { %v1871_v14 = vpop.f32.mrb[6].mxu0 }
 0x464   : > { %v932_v15 = vpop.f32.mrb[7].mxu0 }
 0x465   : > { %v1980_v16 = vpack.c.bf16 %v1871_v14, %v932_v15 }
 0x467   : > { %1982 = vmatprep.subr.msk.bf16.mxu0 %vm2178_vm2, %v1980_v16 }
 0x468   : > { %1985 = vmatpush3.bf16.xpose.msk.msra.mxu0 %vm2178_vm2, %v1980_v16 }
 0x469   : > { %1991 = vmatprep.subr.bf16.mxu0 %v1990_v35 }
 0x46f   : > { %1888 = vmatmul.mubr.msk.f32.vlgmr.msra.gmra.mrb[8].mxu0 %vm588_vm1, %v1860_v49  ;;  %v1998_v49 = vpack.c.bf16 %v1441_v48, %v1440_v47 }
 0x470   : > { %1993 = vmatpush3.bf16.msra.mxu0 %v1990_v35 }
 0x471   : > { %1995 = vmatprep.subr.bf16.mxu0 %v1994_v44  ;;  %1999 = vmatprep.subr.bf16.mxu1 %v1998_v49 }
 0x542   : > { %v1889_v17 = vpop.f32.mrb[8].mxu0 }
 0x543   : > { %v1099_v18 = vpop.f32.mrb[9].mxu0  ;;  %v1111_v20 = vsel %vm588_vm1, %v1889_v17, -inf }
 0x544   : > { %1112 = vmax.xlane.f32.xlu1 %v1111_v20  ;;  %v1108_v21 = vsel %vm588_vm1, %v1099_v18, -inf }
 0x545   : > { %1109 = vmax.xlane.f32.xlu0 %v1108_v21 }
 0x5d1   : > { %v1113_v22 = vpop.xlane.xlu1 %1112 }
 0x5d2   : > { %v1115_v24 = vsub.f32 %v1889_v17, %v1113_v22  ;;  %v1110_v25 = vpop.xlane.xlu0 %1109 }
 0x5d3   : > { %v1114_v26 = vsub.f32 %v1099_v18, %v1110_v25 }
 0x5d4   : > { %v1118_v27 = vmul.f32 1.442695, %v1115_v24 }
 0x5d5   : > { %v1116_v28 = vmul.f32 1.442695, %v1114_v26 }
 0x5d7   : > { %2025 = vpow2.f32 %v1116_v28 }
 0x5d8   : > { %2027 = vpow2.f32 %v1118_v27 }
 0x5e1   : > { %v2026_v29 = vpop.eup %2025 }
 0x5e2   : > { %v1120_v30 = vsel %vm588_vm1, %v2026_v29, 0.0  ;;  %v2028_v31 = vpop.eup %2027 }
 0x5e3   : > { %1121 = vadd.xlane.f32.xlu1 %v1120_v30  ;;  %v1123_v32 = vsel %vm588_vm1, %v2028_v31, 0.0 }
 0x5e7   : > { %1124 = vadd.xlane.f32.xlu1 %v1123_v32 }
 0x670   : > { %v1122_v36 = vpop.xlane.xlu1 %1121 }
 0x671   : > { %2029 = vrcp.f32 %v1122_v36 }
 0x674   : > { %v1125_v37 = vpop.xlane.xlu1 %1124 }
 0x675   : > { %2031 = vrcp.f32 %v1125_v37 }
 0x67b   : > { %v2030_v38 = vpop.eup %2029 }
 0x67c   : > { %v1128_v39 = vmul.f32 %v2030_v38, %v2026_v29 }
 0x67e   : > { %1894 = vmatprep.mubr.msk.f32.mxu1 %vm588_vm1, %v1128_v39 }
 0x67f   : > { %v2032_v40 = vpop.eup %2031 }
 0x680   : > { %v1129_v41 = vmul.f32 %v2032_v40, %v2028_v31 }
 0x682   : > { %1895 = vmatmul.mubr.msk.f32.vlgmr.msra.gmra.mrb[8].mxu1 %vm588_vm1, %v1129_v41 }
 0x683   : > { %2001 = vmatpush3.bf16.msra.mxu1 %v1998_v49 }
 0x684   : > { %2003 = vmatprep.subr.bf16.mxu1 %v2002_v52 }
 0x687   : > { %2005 = vmatpush3.bf16.msra.mxu1 %v2002_v52 }
 0x755   : > { %v1896_v45 = vpop.f32.mrb[8].mxu1 }
 0x756   : > { %v1202_v46 = vpop.f32.mrb[9].mxu1 }
 0x757   : > { %1901 = vmatprep.mubr.msk.f32.mxu0 %vm588_vm1, %v1202_v46  ;;  %v1730_v46 = vld [vmem:[%s2305_s7] ss:$0 sm:$0xff] }
 0x758   : > { %1902 = vmatmul.mubr.msk.f32.vlgmr.msra.gmra.mrb[10].mxu0 %vm588_vm1, %v1896_v45 }
 0x759   : > { %1997 = vmatpush3.bf16.msra.mxu0 %v1994_v44  ;;  %1908 = vmatprep.mubr.msk.f32.mxu0 %vm588_vm1, %v770_v13 }
 0x760   : > { %1909 = vmatmul.mubr.msk.f32.vlgmr.msra.gmra.mrb[10].mxu0 %vm588_vm1, %v1849_v12 }
 0x833   : > { %v1910_v54 = vpop.f32.mrb[10].mxu0 }
 0x834   : > { %v1383_v55 = vadd.f32 %v1910_v54, %v1729_v53  ;;  %v1367_v56 = vpop.f32.mrb[11].mxu0 }
 0x835   : > { %v1382_v57 = vadd.f32 %v1729_v53, %v1367_v56 }
 0x836   : > { %v1385_v58 = vadd.f32 %v1383_v55, %v2160_v23 }
 0x837   : > { %v1384_v59 = vadd.f32 %v1382_v57, %v2148_v19 }
 0x838   : > { %v1389_v60 = vmul.f32 0.70710677, %v1385_v58  ;;  %v1387_v43 = vmul.f32 0.5, %v1385_v58 }
 0x839   : > { %v1388_v61 = vmul.f32 0.70710677, %v1384_v59  ;;  %v1386_v41 = vmul.f32 0.5, %v1384_v59 }
 0x83a   : > { %v1391_v62 = vand.u32 2147483647, %v1389_v60  ;;  %vm1431_vm3 = vcmp.lt.f32.partialorder %v1389_v60, 0.0 }
 0x83b   : > { %v1390_v63 = vand.u32 2147483647, %v1388_v61  ;;  %vm1430_vm4 = vcmp.lt.f32.partialorder %v1388_v61, 0.0 }
 0x83c   : > { %v1393_v0 = vmul.f32 0.3275911, %v1391_v62  ;;  %v1419_v4 = vsub.f32 0.0, %v1391_v62 }
 0x83d   : > { %v1392_v1 = vmul.f32 0.3275911, %v1390_v63  ;;  %v1418_v5 = vsub.f32 0.0, %v1390_v63 }
 0x83e   : > { %v1395_v2 = vadd.f32 1.0, %v1393_v0  ;;  %v1421_v7 = vmul.f32 %v1419_v4, %v1391_v62 }
 0x83f   : > { %v1394_v3 = vadd.f32 1.0, %v1392_v1  ;;  %v1420_v10 = vmul.f32 %v1418_v5, %v1390_v63 }
 0x840   : > { %2033 = vrcp.f32 %v1395_v2  ;;  %v1424_v19 = vmul.f32 1.442695, %v1421_v7 }
 0x841   : > { %2035 = vrcp.f32 %v1394_v3  ;;  %v1422_v14 = vmul.f32 1.442695, %v1420_v10 }
 0x842   : > { %2037 = vpow2.f32 %v1424_v19 }
 0x843   : > { %2039 = vpow2.f32 %v1422_v14 }
 0x84a   : > { %v2034_v6 = vpop.eup %2033 }
 0x84b   : > { %v2036_v8 = vpop.eup %2035  ;;  %v1401_v9 = vmul.f32 1.0614054, %v2034_v6 }
 0x84c   : > { %v1400_v23 = vmul.f32 1.0614054, %v2036_v8  ;;  %v2038_v29 = vpop.eup %2037 }
 0x84d   : > { %v1403_v11 = vadd.f32 -1.4531521, %v1401_v9  ;;  %v2040_v31 = vpop.eup %2039 }
 0x84e   : > { %v1402_v12 = vadd.f32 -1.4531521, %v1400_v23 }
 0x84f   : > { %v1405_v13 = vmul.f32 %v2034_v6, %v1403_v11 }
 0x850   : > { %v1404_v15 = vmul.f32 %v2036_v8, %v1402_v12 }
 0x851   : > { %v1407_v16 = vadd.f32 1.4214138, %v1405_v13 }
 0x852   : > { %v1406_v17 = vadd.f32 1.4214138, %v1404_v15 }
 0x853   : > { %v1409_v18 = vmul.f32 %v2034_v6, %v1407_v16 }
 0x854   : > { %v1408_v20 = vmul.f32 %v2036_v8, %v1406_v17 }
 0x855   : > { %v1411_v21 = vadd.f32 -0.28449672, %v1409_v18 }
 0x856   : > { %v1410_v22 = vadd.f32 -0.28449672, %v1408_v20 }
 0x857   : > { %v1413_v24 = vmul.f32 %v2034_v6, %v1411_v21 }
 0x858   : > { %v1412_v25 = vmul.f32 %v2036_v8, %v1410_v22 }
 0x859   : > { %v1415_v26 = vadd.f32 0.2548296, %v1413_v24 }
 0x85a   : > { %v1414_v27 = vadd.f32 0.2548296, %v1412_v25 }
 0x85b   : > { %v1417_v28 = vmul.f32 %v2034_v6, %v1415_v26 }
 0x85c   : > { %v1416_v30 = vmul.f32 %v2036_v8, %v1414_v27 }
 0x85d   : > { %v1427_v32 = vmul.f32 %v2038_v29, %v1417_v28 }
 0x85e   : > { %v1426_v33 = vmul.f32 %v2040_v31, %v1416_v30 }
 0x85f   : > { %v1429_v34 = vsub.f32 1.0, %v1427_v32 }
 0x860   : > { %v1428_v35 = vsub.f32 1.0, %v1426_v33 }
 0x861   : > { %v1433_v36 = vsub.f32 0.0, %v1429_v34 }
 0x862   : > { %v1432_v37 = vsub.f32 0.0, %v1428_v35 }
 0x863   : > { %v1435_v38 = vsel %vm1431_vm3, %v1433_v36, %v1429_v34 }
 0x864   : > { %v1437_v39 = vadd.f32 1.0, %v1435_v38  ;;  %v1434_v40 = vsel %vm1430_vm4, %v1432_v37, %v1428_v35 }
 0x865   : > { %v1436_v42 = vadd.f32 1.0, %v1434_v40 }
 0x866   : > { %v1439_v45 = vmul.f32 %v1437_v39, %v1387_v43 }
 0x867   : > { %v1438_v44 = vmul.f32 %v1436_v42, %v1386_v41 }
 0x869   : > { %1919 = vmatprep.mubr.msk.f32.mxu1 %vm348_vm0, %v1438_v44 }
 0x86a   : > { %1920 = vmatmul.mubr.msk.f32.vlgmr.msra.gmra.mrb[10].mxu1 %vm348_vm0, %v1439_v45 }
 0x93d   : > { %v1921_v47 = vpop.f32.mrb[10].mxu1 }
 0x93e   : > { %v1528_v48 = vadd.f32 %v1921_v47, %v1730_v46  ;;  %v1522_v49 = vpop.f32.mrb[11].mxu1 }
 0x93f   : > { %v1523_v50 = vadd.f32 %v1730_v46, %v1522_v49 }
 0x940   : > { %v1532_v51 = vadd.f32 %v1528_v48, %v1439_v45 }
 0x941   : > { %v1531_v52 = vadd.f32 %v1523_v50, %v1438_v44 }
 0x942   : > { %v1536_v53 = vmul.f32 0.70710677, %v1532_v51  ;;  %v1534_v37 = vmul.f32 0.5, %v1532_v51 }
 0x943   : > { %v1535_v54 = vmul.f32 0.70710677, %v1531_v52  ;;  %v1533_v33 = vmul.f32 0.5, %v1531_v52 }
 0x944   : > { %v1538_v55 = vand.u32 2147483647, %v1536_v53  ;;  %vm1578_vm5 = vcmp.lt.f32.partialorder %v1536_v53, 0.0 }
 0x945   : > { %v1537_v56 = vand.u32 2147483647, %v1535_v54  ;;  %vm1577_vm6 = vcmp.lt.f32.partialorder %v1535_v54, 0.0 }
 0x946   : > { %v1540_v57 = vmul.f32 0.3275911, %v1538_v55  ;;  %v1566_v61 = vsub.f32 0.0, %v1538_v55 }
 0x947   : > { %v1539_v58 = vmul.f32 0.3275911, %v1537_v56  ;;  %v1565_v62 = vsub.f32 0.0, %v1537_v56 }
 0x948   : > { %v1542_v59 = vadd.f32 1.0, %v1540_v57  ;;  %v1568_v0 = vmul.f32 %v1566_v61, %v1538_v55 }
 0x949   : > { %v1541_v60 = vadd.f32 1.0, %v1539_v58  ;;  %v1567_v2 = vmul.f32 %v1565_v62, %v1537_v56 }
 0x94a   : > { %2041 = vrcp.f32 %v1542_v59  ;;  %v1571_v6 = vmul.f32 1.442695, %v1568_v0 }
 0x94b   : > { %2043 = vrcp.f32 %v1541_v60  ;;  %v1569_v8 = vmul.f32 1.442695, %v1567_v2 }
 0x94c   : > { %2045 = vpow2.f32 %v1571_v6 }
 0x94d   : > { %2047 = vpow2.f32 %v1569_v8 }
 0x954   : > { %v2042_v63 = vpop.eup %2041 }
 0x955   : > { %v2044_v1 = vpop.eup %2043  ;;  %v1548_v3 = vmul.f32 1.0614054, %v2042_v63 }
 0x956   : > { %v1547_v4 = vmul.f32 1.0614054, %v2044_v1  ;;  %v2046_v21 = vpop.eup %2045 }
 0x957   : > { %v1550_v5 = vadd.f32 -1.4531521, %v1548_v3  ;;  %v2048_v24 = vpop.eup %2047 }
 0x958   : > { %v1549_v7 = vadd.f32 -1.4531521, %v1547_v4 }
 0x959   : > { %v1552_v9 = vmul.f32 %v2042_v63, %v1550_v5 }
 0x95a   : > { %v1551_v10 = vmul.f32 %v2044_v1, %v1549_v7 }
 0x95b   : > { %v1554_v23 = vadd.f32 1.4214138, %v1552_v9 }
 0x95c   : > { %v1553_v11 = vadd.f32 1.4214138, %v1551_v10 }
 0x95d   : > { %v1556_v19 = vmul.f32 %v2042_v63, %v1554_v23 }
 0x95e   : > { %v1555_v12 = vmul.f32 %v2044_v1, %v1553_v11 }
 0x95f   : > { %v1558_v13 = vadd.f32 -0.28449672, %v1556_v19 }
 0x960   : > { %v1557_v14 = vadd.f32 -0.28449672, %v1555_v12 }
 0x961   : > { %v1560_v15 = vmul.f32 %v2042_v63, %v1558_v13 }
 0x962   : > { %v1559_v16 = vmul.f32 %v2044_v1, %v1557_v14 }
 0x963   : > { %v1562_v17 = vadd.f32 0.2548296, %v1560_v15 }
 0x964   : > { %v1561_v18 = vadd.f32 0.2548296, %v1559_v16 }
 0x965   : > { %v1564_v20 = vmul.f32 %v2042_v63, %v1562_v17 }
 0x966   : > { %v1563_v22 = vmul.f32 %v2044_v1, %v1561_v18 }
 0x967   : > { %v1574_v25 = vmul.f32 %v2046_v21, %v1564_v20 }
 0x968   : > { %v1573_v26 = vmul.f32 %v2048_v24, %v1563_v22 }
 0x969   : > { %v1576_v27 = vsub.f32 1.0, %v1574_v25 }
 0x96a   : > { %v1575_v28 = vsub.f32 1.0, %v1573_v26 }
 0x96b   : > { %v1580_v29 = vsub.f32 0.0, %v1576_v27 }
 0x96c   : > { %v1579_v30 = vsub.f32 0.0, %v1575_v28 }
 0x96d   : > { %v1582_v32 = vsel %vm1578_vm5, %v1580_v29, %v1576_v27 }
 0x96e   : > { %v1581_v31 = vsel %vm1577_vm6, %v1579_v30, %v1575_v28  ;;  %v1584_v36 = vadd.f32 1.0, %v1582_v32 }
 0x96f   : > { %v1583_v34 = vadd.f32 1.0, %v1581_v31 }
 0x970   : > { %v1586_v38 = vmul.f32 %v1584_v36, %v1534_v37 }
 0x971   : > { %v1585_v35 = vmul.f32 %v1583_v34, %v1533_v33 }
 0x973   : > { %1587 = vxpose.xlu1.b32.start [1/2] (short) (narrow) %v1585_v35, 32 }
 0x977   : > { %1588 = vxpose.xlu1.b32.end [2/2] (short) (narrow) %v1586_v38, 32 }
 0x9f3   : > { %v1603_v39 = vpop.trf.xlu1 }
 0x9f4   : > { %1619 = vst.msk [vmem:[%s305_s24] sm:$0xff] %vm588_vm1, %v1603_v39 }
 0x9f7   : > { %v1604_v40 = vpop.trf.xlu1 }
 0x9f8   : > { %1620 = vst.msk [vmem:[%s305_s24 + $0x8] sm:$0xff] %vm588_vm1, %v1604_v40 }
 0x9fb   : > { %v1605_v41 = vpop.trf.xlu1 }
 0x9fc   : > { %1621 = vst.msk [vmem:[%s305_s24 + $0x10] sm:$0xff] %vm588_vm1, %v1605_v41 }
 0x9ff   : > { %v1606_v42 = vpop.trf.xlu1 }
 0xa00   : > { %1622 = vst.msk [vmem:[%s305_s24 + $0x18] sm:$0xff] %vm588_vm1, %v1606_v42 }
 0xa01 PF: > { %s18_s27 = sadd.s32 1, %s2055_s27  }
 0xa02   : > { %p15_p4 = scmp.ge.s32.totalorder %s18_s27, 4  }
 0xa04   :  { %17 = sbr.rel (!%p15_p4) target bundleno = 1 (0x1), region = 86 }

</bundles_post_ra>
